<compile_context>
chip_gen: v7x
topology: tpu7x:2x2x1
jax: 0.10.0
libtpu: 0.0.40
codegen_flags: <defaults>
</compile_context>

<pallas_src>
import functools

import jax
import jax.numpy as jnp
from jax.experimental import pallas as pl
from jax.experimental.pallas import tpu as pltpu

ACT_DTYPE = jnp.bfloat16
VMEM_LIMIT = 48 * 1024 * 1024  # safe on v7x (64 MiB physical); plenty on v5e/v6e

IMAGENET_MEAN = jnp.array([0.485, 0.456, 0.406], jnp.float32)
IMAGENET_STD = jnp.array([0.229, 0.224, 0.225], jnp.float32)


def _round_up(x, m):
    return (x + m - 1) // m * m


def _pick_row_tile(ho):
    for th in (16, 14, 8, 7, 4, 2, 1):
        if ho % th == 0:
            return th
    return ho


def _conv_taps(kh, kw, stride):
    """Tap list [(plane, row_off, col_off, ti, tj)] matching _build_planes ordering."""
    if stride == 1:
        return [(0, ti, tj, ti, tj) for ti in range(kh) for tj in range(kw)]
    assert stride == 2, "only stride 1/2 occur in ResNet50"
    taps = []
    for u in (0, 1):
        for v in (0, 1):
            for ti in range(u, kh, 2):
                for tj in range(v, kw, 2):
                    taps.append((2 * u + v, ti // 2, tj // 2, ti, tj))
    return taps


def _build_planes(x, stride, pad, pad_value=0.0):
    """Pad NHWC x and regroup into parity planes (N, P, Hs, Ws, C) so every conv/pool
    tap becomes a contiguous stride-1 slice.  P=1 for stride 1, P=4 for stride 2."""
    # TODO(synk): this pad / parity-plane stack is an extra HBM pass; a manual-DMA
    # border-masked gather (memory_space=pl.ANY) would remove it.
    n, h, w, c = x.shape
    xp = jnp.pad(x, ((0, 0), (pad, pad), (pad, pad), (0, 0)),
                 constant_values=pad_value)
    if stride == 1:
        return xp[:, None]
    hp, wp = h + 2 * pad, w + 2 * pad
    if hp % 2 or wp % 2:  # keep all parity planes the same shape
        xp = jnp.pad(xp, ((0, 0), (0, hp % 2), (0, wp % 2), (0, 0)),
                     constant_values=pad_value)
    return jnp.stack([xp[:, u::2, v::2, :] for u in (0, 1) for v in (0, 1)], axis=1)


# ---------------------------------------------------------------------------
# Pallas kernels
# ---------------------------------------------------------------------------

def _matmul_bn_kernel(*refs, relu, has_res):
    """out = act(A @ B * scale + bias [+ residual]); single full-K matmul per block."""
    if has_res:
        a_ref, b_ref, scale_ref, bias_ref, res_ref, o_ref = refs
    else:
        a_ref, b_ref, scale_ref, bias_ref, o_ref = refs
        res_ref = None
    y = jnp.dot(a_ref[...], b_ref[...], preferred_element_type=jnp.float32)
    y = y * scale_ref[...] + bias_ref[...]
    if res_ref is not None:
        y = y + res_ref[...].astype(jnp.float32)
    if relu:
        y = jnp.maximum(y, 0.0)
    o_ref[...] = y.astype(o_ref.dtype)


def _conv_tap_kernel(x_ref, w_ref, scale_ref, bias_ref, o_ref, acc_ref, *,
                     taps, th, wo, relu):
    """Row-tiled fused-im2col 3x3 conv: one matmul per tap, accumulated in VMEM."""
    r = pl.program_id(2)
    row0 = r * th
    acc_ref[...] = jnp.zeros_like(acc_ref)
    for t, (p, a, b) in enumerate(taps):
        patch = x_ref[0, p, pl.ds(row0 + a, th), b:b + wo, :]
        # TODO(synk): the (th,wo,cin)->(th*wo,cin) reshape relayouts when wo is not
        # sublane-aligned; padding wo to a multiple of 16 would make it a no-op.
        patch = patch.reshape(th * wo, patch.shape[-1])
        acc_ref[...] += jnp.dot(patch, w_ref[t],
                                preferred_element_type=jnp.float32)
    y = acc_ref[...] * scale_ref[...] + bias_ref[...]
    if relu:
        y = jnp.maximum(y, 0.0)
    o_ref[...] = y.reshape(1, th, wo, y.shape[-1]).astype(o_ref.dtype)


def _maxpool_tap_kernel(x_ref, o_ref, *, taps, th, wo):
    r = pl.program_id(1)
    row0 = r * th
    p0, a0, b0 = taps[0]
    m = x_ref[0, p0, pl.ds(row0 + a0, th), b0:b0 + wo, :]
    for (p, a, b) in taps[1:]:
        m = jnp.maximum(m, x_ref[0, p, pl.ds(row0 + a, th), b:b + wo, :])
    o_ref[...] = m.reshape(1, th, wo, m.shape[-1]).astype(o_ref.dtype)


def _avgpool_kernel(x_ref, o_ref):
    o_ref[...] = jnp.mean(x_ref[...].astype(jnp.float32), axis=1, keepdims=True)


# ---------------------------------------------------------------------------
# Wrappers
# ---------------------------------------------------------------------------

def matmul_bn(a, b, scale, bias, relu, residual=None, out_dtype=ACT_DTYPE):
    """out[m,n] = act(sum_k a[m,k]b[k,n]*scale[n] + bias[n] [+ residual[m,n]]).
    scale/bias are pre-packed (1,N) f32; a/b/residual bf16; full-K tiles."""
    M, K = a.shape
    K2, N = b.shape
    assert K == K2
    Mp = _round_up(M, 256)
    tm = 512 if Mp % 512 == 0 else 256
    tn = 256 if N % 256 == 0 else N
    if Mp != M:
        a = jnp.pad(a, ((0, Mp - M), (0, 0)))
        if residual is not None:
            residual = jnp.pad(residual, ((0, Mp - M), (0, 0)))

    has_res = residual is not None
    in_specs = [
        pl.BlockSpec((tm, K), lambda i, j: (i, 0)),
        pl.BlockSpec((K, tn), lambda i, j: (0, j)),
        pl.BlockSpec((1, tn), lambda i, j: (0, j)),
        pl.BlockSpec((1, tn), lambda i, j: (0, j)),
    ]
    inputs = [a.astype(ACT_DTYPE), b.astype(ACT_DTYPE), scale, bias]
    if has_res:
        in_specs.append(pl.BlockSpec((tm, tn), lambda i, j: (i, j)))
        inputs.append(residual.astype(ACT_DTYPE))

    grid = (Mp // tm, N // tn)
    flops = 2 * Mp * N * K
    bytes_accessed = (Mp * K + K * N + Mp * N * (2 if has_res else 1)) * 2 + 8 * N

    out = pl.pallas_call(
        functools.partial(_matmul_bn_kernel, relu=relu, has_res=has_res),
        out_shape=jax.ShapeDtypeStruct((Mp, N), out_dtype),
        grid_spec=pltpu.PrefetchScalarGridSpec(
            num_scalar_prefetch=0,
            grid=grid,
            in_specs=in_specs,
            out_specs=pl.BlockSpec((tm, tn), lambda i, j: (i, j)),
        ),
        compiler_params=pltpu.CompilerParams(
            dimension_semantics=("parallel", "parallel"),
            vmem_limit_bytes=VMEM_LIMIT),
        cost_estimate=pl.CostEstimate(flops=int(flops), transcendentals=0,
                                      bytes_accessed=int(bytes_accessed)),
    )(*inputs)
    return out[:M] if Mp != M else out


def conv1_bn_relu(x_nchw, p):
    """7x7 stride-2 conv1 + folded BN + ReLU as an explicit im2col matmul (K=147).
    Normalization is folded in: 1/std lives in p['w_mat'], mean is subtracted here;
    zero-padding the centered input matches zero-padding the normalized input."""
    x = jnp.transpose(x_nchw, (0, 2, 3, 1)).astype(jnp.float32)
    x = x - IMAGENET_MEAN.reshape(1, 1, 1, 3)
    n, h, w, _ = x.shape
    kh = kw = 7
    stride, pad = 2, 3
    ho = (h + 2 * pad - kh) // stride + 1
    wo = (w + 2 * pad - kw) // stride + 1
    xp = jnp.pad(x, ((0, 0), (pad, pad), (pad, pad), (0, 0)))
    cols = [xp[:, ti:ti + stride * ho:stride, tj:tj + stride * wo:stride, :]
            for ti in range(kh) for tj in range(kw)]
    patches = jnp.concatenate(cols, axis=-1)              # (n, ho, wo, 147)
    a = patches.reshape(n * ho * wo, kh * kw * 3).astype(ACT_DTYPE)
    out = matmul_bn(a, p['w_mat'], p['scale'], p['bias'], relu=True)
    return out.reshape(n, ho, wo, p['w_mat'].shape[-1])


def conv_bn_spatial(x, p, relu):
    """3x3 conv (bias=False) + folded BN (+ReLU), row-tiled fused im2col."""
    stride = p['stride']
    n, h, w, cin = x.shape
    kh = kw = 3
    pad = 1
    ho = (h + 2 * pad - kh) // stride + 1
    wo = (w + 2 * pad - kw) // stride + 1
    planes = _build_planes(x, stride, pad, 0.0)
    _, nplanes, hs, ws, _ = planes.shape
    w_taps = p['w_taps']                                   # (T, cin, cout) bf16
    t, _, cout = w_taps.shape
    tn = cout if cout <= 256 else 256
    th = _pick_row_tile(ho)
    nr = ho // th

    flops = 2 * n * ho * wo * kh * kw * cin * cout
    bytes_accessed = (planes.size + w_taps.size + n * ho * wo * cout) * 2

    out = pl.pallas_call(
        functools.partial(_conv_tap_kernel, taps=p['taps'], th=th, wo=wo,
                          relu=relu),
        out_shape=jax.ShapeDtypeStruct((n, ho, wo, cout), ACT_DTYPE),
        grid_spec=pltpu.PrefetchScalarGridSpec(
            num_scalar_prefetch=0,
            grid=(cout // tn, n, nr),  # cout slowest -> weights resident across (n, r)
            in_specs=[
                pl.BlockSpec((1, nplanes, hs, ws, cin),
                             lambda j, b, r: (b, 0, 0, 0, 0)),
                pl.BlockSpec((t, cin, tn), lambda j, b, r: (0, 0, j)),
                pl.BlockSpec((1, tn), lambda j, b, r: (0, j)),
                pl.BlockSpec((1, tn), lambda j, b, r: (0, j)),
            ],
            out_specs=pl.BlockSpec((1, th, wo, tn), lambda j, b, r: (b, r, 0, j)),
            scratch_shapes=[pltpu.VMEM((th * wo, tn), jnp.float32)],
        ),
        compiler_params=pltpu.CompilerParams(
            dimension_semantics=("parallel", "parallel", "parallel"),
            vmem_limit_bytes=VMEM_LIMIT),
        cost_estimate=pl.CostEstimate(flops=int(flops), transcendentals=0,
                                      bytes_accessed=int(bytes_accessed)),
    )(planes, w_taps, p['scale'], p['bias'])
    return out


def conv1x1_bn(x, p, stride, relu, residual=None):
    """1x1 conv + folded BN (+ReLU, + fused residual add).  No im2col needed."""
    if stride != 1:
        # TODO(synk): fold the stride-2 subsample into kernel-side strided indexing
        # instead of a wrapper-side strided slice (3 occurrences per forward).
        x = x[:, ::stride, ::stride, :]
    n, h, w, cin = x.shape
    cout = p['w_mat'].shape[-1]
    a = x.reshape(n * h * w, cin)
    res = None if residual is None else residual.reshape(n * h * w, cout)
    out = matmul_bn(a, p['w_mat'], p['scale'], p['bias'], relu, residual=res)
    return out.reshape(n, h, w, cout)


def maxpool_3x3_s2_p1(x):
    n, h, w, c = x.shape
    ho = (h + 2 - 3) // 2 + 1
    wo = (w + 2 - 3) // 2 + 1
    planes = _build_planes(x, 2, 1, pad_value=-jnp.inf)
    _, nplanes, hs, ws, _ = planes.shape
    taps = tuple((pp, a, b) for (pp, a, b, _, _) in _conv_taps(3, 3, 2))
    th = _pick_row_tile(ho)
    nr = ho // th
    out = pl.pallas_call(
        functools.partial(_maxpool_tap_kernel, taps=taps, th=th, wo=wo),
        out_shape=jax.ShapeDtypeStruct((n, ho, wo, c), x.dtype),
        grid_spec=pltpu.PrefetchScalarGridSpec(
            num_scalar_prefetch=0,
            grid=(n, nr),
            in_specs=[pl.BlockSpec((1, nplanes, hs, ws, c),
                                   lambda b, r: (b, 0, 0, 0, 0))],
            out_specs=pl.BlockSpec((1, th, wo, c), lambda b, r: (b, r, 0, 0)),
        ),
        compiler_params=pltpu.CompilerParams(
            dimension_semantics=("parallel", "parallel"),
            vmem_limit_bytes=VMEM_LIMIT),
    )(planes)
    return out


def global_avgpool(x):
    """AdaptiveAvgPool2d(1) + flatten.  NHWC -> [N, C] float32."""
    n, h, w, c = x.shape
    xr = x.reshape(n, h * w, c)
    out = pl.pallas_call(
        _avgpool_kernel,
        out_shape=jax.ShapeDtypeStruct((n, 1, c), jnp.float32),
        grid_spec=pltpu.PrefetchScalarGridSpec(
            num_scalar_prefetch=0,
            grid=(n,),
            in_specs=[pl.BlockSpec((1, h * w, c), lambda b: (b, 0, 0))],
            out_specs=pl.BlockSpec((1, 1, c), lambda b: (b, 0, 0)),
        ),
        compiler_params=pltpu.CompilerParams(
            dimension_semantics=("parallel",),
            vmem_limit_bytes=VMEM_LIMIT),
    )(xr)
    return out.reshape(n, c)


# ---------------------------------------------------------------------------
# ResNet50 parameters (deterministic synthetic init), one-time packing, forward
# ---------------------------------------------------------------------------

def _conv_bn_params(key, cin, cout, k):
    kw_key, kg, kb, krm, krv = jax.random.split(key, 5)
    fan_in = cin * k * k
    w = jax.random.normal(kw_key, (k, k, cin, cout), jnp.float32) * jnp.sqrt(2.0 / fan_in)
    gamma = 1.0 + 0.1 * jax.random.normal(kg, (cout,), jnp.float32)
    beta = 0.05 * jax.random.normal(kb, (cout,), jnp.float32)
    running_mean = 0.05 * jax.random.normal(krm, (cout,), jnp.float32)
    running_var = 1.0 + 0.1 * jax.random.uniform(krv, (cout,), jnp.float32)
    eps = 1e-5
    scale = gamma / jnp.sqrt(running_var + eps)
    bias = beta - running_mean * scale
    return {'w': w, 'scale': scale, 'bias': bias}


def init_resnet50_params(key):
    keys = iter(jax.random.split(key, 64))
    params = {'conv1': _conv_bn_params(next(keys), 3, 64, 7)}

    def make_layer(inplanes, planes, blocks):
        layer = []
        for b in range(blocks):
            blk = {
                'conv1': _conv_bn_params(next(keys), inplanes, planes, 1),
                'conv2': _conv_bn_params(next(keys), planes, planes, 3),
                'conv3': _conv_bn_params(next(keys), planes, planes * 4, 1),
            }
            if b == 0:  # inplanes != planes*4 (and/or stride != 1) -> downsample
                blk['downsample'] = _conv_bn_params(next(keys), inplanes, planes * 4, 1)
            layer.append(blk)
            inplanes = planes * 4
        return layer, inplanes

    inpl = 64
    params['layer1'], inpl = make_layer(inpl, 64, 3)
    params['layer2'], inpl = make_layer(inpl, 128, 4)
    params['layer3'], inpl = make_layer(inpl, 256, 6)
    params['layer4'], inpl = make_layer(inpl, 512, 3)
    return params


def pack_resnet50_params(raw):
    """One-time weight prep: bf16 casts, per-tap packing, (1,C) f32 BN scale/bias,
    conv1 1/std fold + im2col flattening (eval-mode BN only)."""
    def sb(p):
        cout = p['scale'].shape[0]
        return (p['scale'].reshape(1, cout).astype(jnp.float32),
                p['bias'].reshape(1, cout).astype(jnp.float32))

    def pack_1x1(p):
        cin, cout = p['w'].shape[2], p['w'].shape[3]
        scale2, bias2 = sb(p)
        return {'w_mat': p['w'].reshape(cin, cout).astype(ACT_DTYPE),
                'scale': scale2, 'bias': bias2}

    def pack_3x3(p, stride):
        taps = _conv_taps(3, 3, stride)
        w_taps = jnp.stack([p['w'][ti, tj] for (_, _, _, ti, tj) in taps],
                           axis=0).astype(ACT_DTYPE)       # (T, cin, cout)
        scale2, bias2 = sb(p)
        return {'w_taps': w_taps,
                'taps': tuple((pp, a, c) for (pp, a, c, _, _) in taps),
                'stride': stride, 'scale': scale2, 'bias': bias2}

    s1, b1 = sb(raw['conv1'])
    w1 = raw['conv1']['w'] / IMAGENET_STD.reshape(1, 1, 3, 1)   # fold 1/std into conv1
    packed = {'conv1': {'w_mat': w1.reshape(7 * 7 * 3, 64).astype(ACT_DTYPE),
                        'scale': s1, 'bias': b1}}
    for name, stride in (('layer1', 1), ('layer2', 2), ('layer3', 2), ('layer4', 2)):
        blocks = []
        for bi, blk in enumerate(raw[name]):
            bstride = stride if bi == 0 else 1
            pb = {'stride': bstride,
                  'conv1': pack_1x1(blk['conv1']),
                  'conv2': pack_3x3(blk['conv2'], bstride),
                  'conv3': pack_1x1(blk['conv3'])}
            if 'downsample' in blk:
                pb['downsample'] = pack_1x1(blk['downsample'])
            blocks.append(pb)
        packed[name] = blocks
    return packed


def bottleneck(x, blk):
    stride = blk['stride']
    if 'downsample' in blk:
        identity = conv1x1_bn(x, blk['downsample'], stride, relu=False)
    else:
        identity = x
    out = conv1x1_bn(x, blk['conv1'], 1, relu=True)
    out = conv_bn_spatial(out, blk['conv2'], relu=True)
    # conv3 + BN, residual add and final ReLU fused into the matmul epilogue.
    out = conv1x1_bn(out, blk['conv3'], 1, relu=True, residual=identity)
    return out


def resnet50_forward(x_nchw, packed):
    """Returns 2048-d pooled features (resnet.fc is replaced by Identity)."""
    x = conv1_bn_relu(x_nchw, packed['conv1'])    # (x-mean)/std folded + conv1+bn1+relu
    x = maxpool_3x3_s2_p1(x)                      # maxpool
    for name in ('layer1', 'layer2', 'layer3', 'layer4'):
        for blk in packed[name]:
            x = bottleneck(x, blk)
    feats = global_avgpool(x)                     # avgpool + flatten
    return feats                                  # fc == Identity


if __name__ == "__main__":
    key = jax.random.PRNGKey(0)
    k_x, k_p = jax.random.split(key)
    # Small-but-consistent shapes: batch=2, 3 channels, 32x32 spatial (NCHW like PyTorch).
    x = jax.random.uniform(k_x, (2, 3, 32, 32), jnp.float32)
    raw_params = init_resnet50_params(k_p)
    params = pack_resnet50_params(raw_params)     # one-time weight packing (bf16, taps)

    feats = resnet50_forward(x, params)
    feats = jax.block_until_ready(feats)
    assert feats.shape == (2, 2048), feats.shape
    assert bool(jnp.all(jnp.isfinite(feats)))
    print("KERNEL_OK")
</pallas_src>

<mosaic_0001>
module attributes {stable_mosaic.version = 11 : i64} {
  func.func @_matmul_bn_kernel(%arg0: i32, %arg1: i32, %arg2: memref<512x147xbf16, #tpu.memory_space<vmem>>, %arg3: memref<147x64xbf16, #tpu.memory_space<vmem>>, %arg4: memref<1x64xf32, #tpu.memory_space<vmem>>, %arg5: memref<1x64xf32, #tpu.memory_space<vmem>>, %arg6: memref<512x64xbf16, #tpu.memory_space<vmem>>) attributes {dimension_semantics = [#tpu.dimension_semantics<parallel>, #tpu.dimension_semantics<parallel>], iteration_bounds = array<i64: 1, 1>, scalar_prefetch = 0 : i64, scratch_operands = 0 : i64, tpu.core_type = #tpu.core_type<tc>, window_params = [{transform_indices = @transform_0, window_bounds = array<i64: 512, 147>}, {transform_indices = @transform_1, window_bounds = array<i64: 147, 64>}, {transform_indices = @transform_2, window_bounds = array<i64: 1, 64>}, {transform_indices = @transform_3, window_bounds = array<i64: 1, 64>}, {transform_indices = @transform_4, window_bounds = array<i64: 512, 64>}]} {
    %c0 = arith.constant 0 : index
    %c0_0 = arith.constant 0 : index
    %0 = vector.load %arg2[%c0, %c0_0] : memref<512x147xbf16, #tpu.memory_space<vmem>>, vector<512x147xbf16>
    %c0_1 = arith.constant 0 : index
    %c0_2 = arith.constant 0 : index
    %1 = vector.load %arg3[%c0_1, %c0_2] : memref<147x64xbf16, #tpu.memory_space<vmem>>, vector<147x64xbf16>
    %cst = arith.constant dense<0.000000e+00> : vector<512x64xf32>
    %2 = tpu.matmul %0, %1, %cst {dimension_numbers = #tpu.dot_dimension_numbers<[1], [0], [0], [1], [0, 0, 1, 1], [], []>} : vector<512x147xbf16>, vector<147x64xbf16>, vector<512x64xf32> -> vector<512x64xf32>
    %c0_3 = arith.constant 0 : index
    %c0_4 = arith.constant 0 : index
    %3 = vector.load %arg4[%c0_3, %c0_4] : memref<1x64xf32, #tpu.memory_space<vmem>>, vector<1x64xf32>
    %4 = vector.broadcast %3 : vector<1x64xf32> to vector<512x64xf32>
    %5 = arith.mulf %2, %4 : vector<512x64xf32>
    %c0_5 = arith.constant 0 : index
    %c0_6 = arith.constant 0 : index
    %6 = vector.load %arg5[%c0_5, %c0_6] : memref<1x64xf32, #tpu.memory_space<vmem>>, vector<1x64xf32>
    %7 = vector.broadcast %6 : vector<1x64xf32> to vector<512x64xf32>
    %8 = arith.addf %5, %7 : vector<512x64xf32>
    %cst_7 = arith.constant 0.000000e+00 : f32
    %9 = vector.broadcast %cst_7 : f32 to vector<512x64xf32>
    %10 = arith.maximumf %8, %9 : vector<512x64xf32>
    %11 = arith.truncf %10 : vector<512x64xf32> to vector<512x64xbf16>
    %c0_8 = arith.constant 0 : index
    %c0_9 = arith.constant 0 : index
    %12 = vector.load %arg6[%c0_8, %c0_9] : memref<512x64xbf16, #tpu.memory_space<vmem>>, vector<512x64xbf16>
    tpu.vector_store %arg6[%c0_8, %c0_9], %11 {strides = array<i32>} : memref<512x64xbf16, #tpu.memory_space<vmem>>, vector<512x64xbf16>,
    return
  }
  func.func @transform_0(%arg0: i32, %arg1: i32) -> (i32, i32) {
    %c0_i32 = arith.constant 0 : i32
    %c0_i32_0 = arith.constant 0 : i32
    return %arg0, %c0_i32 : i32, i32
  }
  func.func @transform_1(%arg0: i32, %arg1: i32) -> (i32, i32) {
    %c0_i32 = arith.constant 0 : i32
    %c0_i32_0 = arith.constant 0 : i32
    return %c0_i32, %arg1 : i32, i32
  }
  func.func @transform_2(%arg0: i32, %arg1: i32) -> (i32, i32) {
    %c0_i32 = arith.constant 0 : i32
    %c0_i32_0 = arith.constant 0 : i32
    return %c0_i32, %arg1 : i32, i32
  }
  func.func @transform_3(%arg0: i32, %arg1: i32) -> (i32, i32) {
    %c0_i32 = arith.constant 0 : i32
    %c0_i32_0 = arith.constant 0 : i32
    return %c0_i32, %arg1 : i32, i32
  }
  func.func @transform_4(%arg0: i32, %arg1: i32) -> (i32, i32) {
    %c0_i32 = arith.constant 0 : i32
    return %arg0, %arg1 : i32, i32
  }
}

</mosaic_0001>

<bundles_post_ra>
// kernel: tpu_custom_call.1
= control target key start
LH: loop header
LB: loop body
LE: loop exit
PB: predicated region body
PF: predicated region fallthrough
CT: control target
= control target key end

     0   :  { %v1734_v0 = vmov 0   ;;  %vm446_vm0 = vcmask 154624   ;;  %vm543_vm1 = vcmask 1040384   ;;  %vm544_vm2 = vcmask 1041408   ;;  %s2409_s1 = inlined_call_operand.vmem [shape: bf16[147,64], index: 1, kind: input, shape index: {}]   ;;  %s2410_s0 = inlined_call_operand.vmem [shape: bf16[512,147], index: 0, kind: input, shape index: {}]   ;;  %s2411_s2 = inlined_call_operand.vmem [shape: f32[1,64], index: 2, kind: input, shape index: {}]   ;;  %s2412_s3 = inlined_call_operand.vmem [shape: f32[1,64], index: 3, kind: input, shape index: {}]   ;;  %s2413_s4 = inlined_call_operand.vmem [shape: bf16[512,64], index: 4, kind: output, shape index: {}]  }
   0x1   :  { %550 = vmatprep.subr.bf16.mxu0 %v1734_v0  ;;  %1606 = vmatprep.subr.bf16.mxu1 %v1734_v0  ;;  %v1628_v1 = vld [vmem:[%s2409_s1] sm:$0xff]   ;;  %v1629_v2 = vld [vmem:[%s2409_s1 + $0x8] sm:$0xff]   ;;  %v1630_v3 = vld [vmem:[%s2409_s1 + $0x10] sm:$0xff]   ;;  %v1735_v11 = vmov 65535   ;;  %vm1301_vm3 = vcmask 519168  }
   0x2   :  { %551 = vmatpush1.bf16.msra.mxu0 %v1628_v1  ;;  %1616 = vmatpush1.bf16.msra.mxu1 %v1628_v1  ;;  %v1631_v4 = vld [vmem:[%s2409_s1 + $0x18] sm:$0xff]   ;;  %v1640_v5 = vld [vmem:[%s2410_s0 + $0x4] ss:$8 sps:$4 sm:$0xff]   ;;  %v1634_v9 = vld [vmem:[%s2409_s1 + $0x30] sm:$0xff]   ;;  %v545_v12 = vsel %vm543_vm1, 4294967295, %v1735_v11 }
   0x3   :  { %552 = vmatprep.subr.bf16.mxu0 %v1734_v0  ;;  %1607 = vmatprep.subr.bf16.mxu1 %v1734_v0  ;;  %v1643_v6 = vld [vmem:[%s2410_s0 + $0x104] ss:$8 sps:$4 sm:$0xff]   ;;  %v1635_v10 = vld [vmem:[%s2409_s1 + $0x38] sm:$0xff]   ;;  %v1637_v14 = vld [vmem:[%s2409_s1 + $0x48] ss:$0 sps:$4 sm:$0x33]  }
   0x4   :  { %1444 = vmatprep.mubr.msk.bf16.mxu0 %vm446_vm0, %v1640_v5  ;;  %v1632_v7 = vld [vmem:[%s2409_s1 + $0x20] sm:$0xff]   ;;  %1460 = vmatprep.mubr.msk.bf16.mxu1 %vm446_vm0, %v1643_v6  ;;  %v1633_v8 = vld [vmem:[%s2409_s1 + $0x28] sm:$0xff]   ;;  %v546_v15 = vsel %vm544_vm2, %v545_v12, 0  ;;  %v1644_v19 = vld [vmem:[%s2410_s0 + $0x14] ss:$8 sps:$4 sm:$0xff]  }
   0x5   :  { %v1636_v13 = vld [vmem:[%s2409_s1 + $0x40] sm:$0xff]   ;;  %v548_v16 = vand.u32 %v1637_v14, %v546_v15  ;;  %v1646_v20 = vld [vmem:[%s2410_s0 + $0x114] ss:$8 sps:$4 sm:$0xff]   ;;  %v1648_v21 = vld [vmem:[%s2410_s0 + $0x10] ss:$8 sps:$4 sm:$0xff]  }
   0x6   :  { %553 = vmatpush1.bf16.msra.mxu0 %v1629_v2  ;;  %1617 = vmatpush1.bf16.msra.mxu1 %v1629_v2  ;;  %v1638_v17 = vld [vmem:[%s2410_s0] ss:$8 sps:$4 sm:$0xff]   ;;  %v1649_v22 = vld [vmem:[%s2410_s0 + $0x110] ss:$8 sps:$4 sm:$0xff]   ;;  %v1650_v23 = vld [vmem:[%s2410_s0 + $0x24] ss:$8 sps:$4 sm:$0xff]  }
   0x7   :  { %554 = vmatprep.subr.bf16.mxu0 %v1734_v0  ;;  %1608 = vmatprep.subr.bf16.mxu1 %v1734_v0  ;;  %v1641_v18 = vld [vmem:[%s2410_s0 + $0x100] ss:$8 sps:$4 sm:$0xff]   ;;  %v1652_v24 = vld [vmem:[%s2410_s0 + $0x124] ss:$8 sps:$4 sm:$0xff]   ;;  %v1656_v27 = vld [vmem:[%s2410_s0 + $0x34] ss:$8 sps:$4 sm:$0xff]  }
   0x8   :  { %v1654_v25 = vld [vmem:[%s2410_s0 + $0x20] ss:$8 sps:$4 sm:$0xff]   ;;  %v1658_v28 = vld [vmem:[%s2410_s0 + $0x134] ss:$8 sps:$4 sm:$0xff]   ;;  %v1660_v29 = vld [vmem:[%s2410_s0 + $0x30] ss:$8 sps:$4 sm:$0xff]  }
   0x9   :  { %v1655_v26 = vld [vmem:[%s2410_s0 + $0x120] ss:$8 sps:$4 sm:$0xff]   ;;  %v1661_v30 = vld [vmem:[%s2410_s0 + $0x130] ss:$8 sps:$4 sm:$0xff]   ;;  %v1662_v31 = vld [vmem:[%s2410_s0 + $0x44] ss:$8 sps:$4 sm:$0xff]  }
   0xa   :  { %555 = vmatpush1.bf16.msra.mxu0 %v1630_v3  ;;  %1618 = vmatpush1.bf16.msra.mxu1 %v1630_v3  ;;  %v1664_v32 = vld [vmem:[%s2410_s0 + $0x144] ss:$8 sps:$4 sm:$0xff]   ;;  %v1666_v33 = vld [vmem:[%s2410_s0 + $0x40] ss:$8 sps:$4 sm:$0xff]   ;;  %v1668_v35 = vld [vmem:[%s2410_s0 + $0x54] ss:$8 sps:$4 sm:$0xff]  }
   0xb   :  { %556 = vmatprep.subr.bf16.mxu0 %v1734_v0  ;;  %1609 = vmatprep.subr.bf16.mxu1 %v1734_v0  ;;  %v1667_v34 = vld [vmem:[%s2410_s0 + $0x140] ss:$8 sps:$4 sm:$0xff]   ;;  %v1670_v36 = vld [vmem:[%s2410_s0 + $0x154] ss:$8 sps:$4 sm:$0xff]   ;;  %v1672_v37 = vld [vmem:[%s2410_s0 + $0x50] ss:$8 sps:$4 sm:$0xff]  }
   0xc   :  { %v1673_v38 = vld [vmem:[%s2410_s0 + $0x150] ss:$8 sps:$4 sm:$0xff]   ;;  %v1674_v39 = vld [vmem:[%s2410_s0 + $0x64] ss:$8 sps:$4 sm:$0xff]   ;;  %v1678_v41 = vld [vmem:[%s2410_s0 + $0x60] ss:$8 sps:$4 sm:$0xff]  }
   0xd   :  { %v1676_v40 = vld [vmem:[%s2410_s0 + $0x164] ss:$8 sps:$4 sm:$0xff]   ;;  %v1679_v42 = vld [vmem:[%s2410_s0 + $0x160] ss:$8 sps:$4 sm:$0xff]   ;;  %v1680_v43 = vld [vmem:[%s2410_s0 + $0x74] ss:$8 sps:$4 sm:$0xff]  }
   0xe   :  { %557 = vmatpush1.bf16.msra.mxu0 %v1631_v4  ;;  %1619 = vmatpush1.bf16.msra.mxu1 %v1631_v4  ;;  %v1682_v44 = vld [vmem:[%s2410_s0 + $0x174] ss:$8 sps:$4 sm:$0xff]   ;;  %v1684_v45 = vld [vmem:[%s2410_s0 + $0x70] ss:$8 sps:$4 sm:$0xff]   ;;  %v1686_v47 = vld [vmem:[%s2410_s0 + $0x84] ss:$8 sps:$4 sm:$0xff]  }
   0xf   :  { %558 = vmatprep.subr.bf16.mxu0 %v1734_v0  ;;  %1610 = vmatprep.subr.bf16.mxu1 %v1734_v0  ;;  %v1685_v46 = vld [vmem:[%s2410_s0 + $0x170] ss:$8 sps:$4 sm:$0xff]   ;;  %v1688_v48 = vld [vmem:[%s2410_s0 + $0x184] ss:$8 sps:$4 sm:$0xff]   ;;  %v1690_v49 = vld [vmem:[%s2410_s0 + $0x80] ss:$8 sps:$4 sm:$0xff]  }
  0x10   :  { %v1691_v50 = vld [vmem:[%s2410_s0 + $0x180] ss:$8 sps:$4 sm:$0xff]   ;;  %v1692_v51 = vld [vmem:[%s2410_s0 + $0x94] ss:$8 sps:$4 sm:$0xff]   ;;  %v1696_v53 = vld [vmem:[%s2410_s0 + $0x90] ss:$8 sps:$4 sm:$0xff]  }
  0x11   :  { %v1694_v52 = vld [vmem:[%s2410_s0 + $0x194] ss:$8 sps:$4 sm:$0xff]   ;;  %v1697_v54 = vld [vmem:[%s2410_s0 + $0x190] ss:$8 sps:$4 sm:$0xff]   ;;  %v1698_v55 = vld [vmem:[%s2410_s0 + $0xa4] ss:$8 sps:$4 sm:$0xff]  }
  0x12   :  { %559 = vmatpush1.bf16.msra.mxu0 %v1632_v7  ;;  %1620 = vmatpush1.bf16.msra.mxu1 %v1632_v7  ;;  %v1700_v56 = vld [vmem:[%s2410_s0 + $0x1a4] ss:$8 sps:$4 sm:$0xff]   ;;  %v1702_v57 = vld [vmem:[%s2410_s0 + $0xa0] ss:$8 sps:$4 sm:$0xff]   ;;  %v1704_v59 = vld [vmem:[%s2410_s0 + $0xb4] ss:$8 sps:$4 sm:$0xff]  }
  0x13   :  { %560 = vmatprep.subr.bf16.mxu0 %v1734_v0  ;;  %1611 = vmatprep.subr.bf16.mxu1 %v1734_v0  ;;  %v1703_v58 = vld [vmem:[%s2410_s0 + $0x1a0] ss:$8 sps:$4 sm:$0xff]   ;;  %v1706_v60 = vld [vmem:[%s2410_s0 + $0x1b4] ss:$8 sps:$4 sm:$0xff]   ;;  %v1708_v61 = vld [vmem:[%s2410_s0 + $0xb0] ss:$8 sps:$4 sm:$0xff]  }
  0x14   :  { %v1709_v62 = vld [vmem:[%s2410_s0 + $0x1b0] ss:$8 sps:$4 sm:$0xff]   ;;  %v1710_v63 = vld [vmem:[%s2410_s0 + $0xc4] ss:$8 sps:$4 sm:$0xff]   ;;  %v1714_v1 = vld [vmem:[%s2410_s0 + $0xc0] ss:$8 sps:$4 sm:$0xff]  }
  0x15   :  { %v1715_v2 = vld [vmem:[%s2410_s0 + $0x1c0] ss:$8 sps:$4 sm:$0xff]   ;;  %v1716_v3 = vld [vmem:[%s2410_s0 + $0xd4] ss:$8 sps:$4 sm:$0xff]   ;;  %v1720_v5 = vld [vmem:[%s2410_s0 + $0xd0] ss:$8 sps:$4 sm:$0xff]  }
  0x16   :  { %561 = vmatpush1.bf16.msra.mxu0 %v1633_v8  ;;  %1621 = vmatpush1.bf16.msra.mxu1 %v1633_v8  ;;  %v1718_v4 = vld [vmem:[%s2410_s0 + $0x1d4] ss:$8 sps:$4 sm:$0xff]   ;;  %v1721_v6 = vld [vmem:[%s2410_s0 + $0x1d0] ss:$8 sps:$4 sm:$0xff]   ;;  %v1722_v7 = vld [vmem:[%s2410_s0 + $0xe4] ss:$8 sps:$4 sm:$0xff]  }
  0x17   :  { %562 = vmatprep.subr.bf16.mxu0 %v1734_v0  ;;  %1612 = vmatprep.subr.bf16.mxu1 %v1734_v0  ;;  %v1724_v8 = vld [vmem:[%s2410_s0 + $0x1e4] ss:$8 sps:$4 sm:$0xff]   ;;  %v1728_v11 = vld [vmem:[%s2410_s0 + $0xf4] ss:$8 sps:$4 sm:$0xff]   ;;  %v1733_v14 = vld [vmem:[%s2410_s0 + $0x1f0] ss:$8 sps:$4 sm:$0xff]  }
  0x18   :  { %v1730_v12 = vld [vmem:[%s2410_s0 + $0x1f4] ss:$8 sps:$4 sm:$0xff]   ;;  %v2018_v15 = vld [vmem:[%s2411_s2] ss:$0 sm:$0xff] }
  0x1a   :  { %563 = vmatpush1.bf16.msra.mxu0 %v1634_v9  ;;  %1622 = vmatpush1.bf16.msra.mxu1 %v1634_v9  ;;  %v1726_v9 = vld [vmem:[%s2410_s0 + $0xe0] ss:$8 sps:$4 sm:$0xff]  }
  0x1b   :  { %564 = vmatprep.subr.bf16.mxu0 %v1734_v0  ;;  %1613 = vmatprep.subr.bf16.mxu1 %v1734_v0 }
  0x1e   :  { %565 = vmatpush1.bf16.msra.mxu0 %v1635_v10  ;;  %1623 = vmatpush1.bf16.msra.mxu1 %v1635_v10  ;;  %v1727_v10 = vld [vmem:[%s2410_s0 + $0x1e0] ss:$8 sps:$4 sm:$0xff]  }
  0x1f   :  { %566 = vmatprep.subr.bf16.mxu0 %v1734_v0  ;;  %1614 = vmatprep.subr.bf16.mxu1 %v1734_v0 }
  0x22   :  { %567 = vmatpush1.bf16.msra.mxu0 %v1636_v13  ;;  %1624 = vmatpush1.bf16.msra.mxu1 %v1636_v13  ;;  %v1732_v13 = vld [vmem:[%s2410_s0 + $0xf0] ss:$8 sps:$4 sm:$0xff]  }
  0x23   :  { %568 = vmatprep.subr.bf16.mxu0 %v1734_v0  ;;  %1615 = vmatprep.subr.bf16.mxu1 %v1734_v0  ;;  %v1712_v0 = vld [vmem:[%s2410_s0 + $0x1c4] ss:$8 sps:$4 sm:$0xff]  }
  0x26   :  { %569 = vmatpush1.bf16.msra.mxu0 %v548_v16  ;;  %1625 = vmatpush1.bf16.msra.mxu1 %v548_v16 }
  0x29   :  { %583 = vmatmul.mubr.bf16.vlgmr.msra.gmra.mrb[0].mxu0 %v1638_v17  ;;  %711 = vmatmul.mubr.bf16.vlgmr.msra.gmra.mrb[0].mxu1 %v1641_v18  ;;  %v2023_v17 = vld [vmem:[%s2412_s3] ss:$0 sm:$0xff] }
  0x2a   :  { %1445 = vmatprep.mubr.msk.bf16.mxu0 %vm446_vm0, %v1644_v19  ;;  %1461 = vmatprep.mubr.msk.bf16.mxu1 %vm446_vm0, %v1646_v20 }
  0x31   :  { %591 = vmatmul.mubr.bf16.gmra.mrb[4].mxu0 %v1648_v21  ;;  %719 = vmatmul.mubr.bf16.gmra.mrb[4].mxu1 %v1649_v22 }
  0x32   :  { %1446 = vmatprep.mubr.msk.bf16.mxu0 %vm446_vm0, %v1650_v23  ;;  %1462 = vmatprep.mubr.msk.bf16.mxu1 %vm446_vm0, %v1652_v24 }
  0x39   :  { %599 = vmatmul.mubr.bf16.gmra.mrb[8].mxu0 %v1654_v25  ;;  %727 = vmatmul.mubr.bf16.gmra.mrb[8].mxu1 %v1655_v26 }
  0x3a   :  { %1447 = vmatprep.mubr.msk.bf16.mxu0 %vm446_vm0, %v1656_v27  ;;  %1463 = vmatprep.mubr.msk.bf16.mxu1 %vm446_vm0, %v1658_v28 }
  0x41   :  { %607 = vmatmul.mubr.bf16.gmra.mrb[12].mxu0 %v1660_v29  ;;  %735 = vmatmul.mubr.bf16.gmra.mrb[12].mxu1 %v1661_v30 }
  0x42   :  { %1448 = vmatprep.mubr.msk.bf16.mxu0 %vm446_vm0, %v1662_v31  ;;  %1464 = vmatprep.mubr.msk.bf16.mxu1 %vm446_vm0, %v1664_v32 }
  0x49   :  { %615 = vmatmul.mubr.bf16.gmra.mrb[16].mxu0 %v1666_v33  ;;  %743 = vmatmul.mubr.bf16.gmra.mrb[16].mxu1 %v1667_v34 }
  0x4a   :  { %1449 = vmatprep.mubr.msk.bf16.mxu0 %vm446_vm0, %v1668_v35  ;;  %1465 = vmatprep.mubr.msk.bf16.mxu1 %vm446_vm0, %v1670_v36 }
  0x51   :  { %623 = vmatmul.mubr.bf16.gmra.mrb[20].mxu0 %v1672_v37  ;;  %751 = vmatmul.mubr.bf16.gmra.mrb[20].mxu1 %v1673_v38 }
  0x52   :  { %1450 = vmatprep.mubr.msk.bf16.mxu0 %vm446_vm0, %v1674_v39  ;;  %1466 = vmatprep.mubr.msk.bf16.mxu1 %vm446_vm0, %v1676_v40 }
  0x59   :  { %631 = vmatmul.mubr.bf16.gmra.mrb[24].mxu0 %v1678_v41  ;;  %759 = vmatmul.mubr.bf16.gmra.mrb[24].mxu1 %v1679_v42 }
  0x5a   :  { %1451 = vmatprep.mubr.msk.bf16.mxu0 %vm446_vm0, %v1680_v43  ;;  %1467 = vmatprep.mubr.msk.bf16.mxu1 %vm446_vm0, %v1682_v44 }
  0x61   :  { %639 = vmatmul.mubr.bf16.gmra.mrb[28].mxu0 %v1684_v45  ;;  %767 = vmatmul.mubr.bf16.gmra.mrb[28].mxu1 %v1685_v46 }
  0x62   :  { %1452 = vmatprep.mubr.msk.bf16.mxu0 %vm446_vm0, %v1686_v47  ;;  %1468 = vmatprep.mubr.msk.bf16.mxu1 %vm446_vm0, %v1688_v48 }
  0x69   :  { %647 = vmatmul.mubr.bf16.gmra.mrb[32].mxu0 %v1690_v49  ;;  %775 = vmatmul.mubr.bf16.gmra.mrb[32].mxu1 %v1691_v50 }
  0x6a   :  { %1453 = vmatprep.mubr.msk.bf16.mxu0 %vm446_vm0, %v1692_v51  ;;  %1469 = vmatprep.mubr.msk.bf16.mxu1 %vm446_vm0, %v1694_v52 }
  0x71   :  { %655 = vmatmul.mubr.bf16.gmra.mrb[36].mxu0 %v1696_v53  ;;  %783 = vmatmul.mubr.bf16.gmra.mrb[36].mxu1 %v1697_v54 }
  0x72   :  { %1454 = vmatprep.mubr.msk.bf16.mxu0 %vm446_vm0, %v1698_v55  ;;  %1470 = vmatprep.mubr.msk.bf16.mxu1 %vm446_vm0, %v1700_v56 }
  0x79   :  { %663 = vmatmul.mubr.bf16.gmra.mrb[40].mxu0 %v1702_v57  ;;  %791 = vmatmul.mubr.bf16.gmra.mrb[40].mxu1 %v1703_v58 }
  0x7a   :  { %1455 = vmatprep.mubr.msk.bf16.mxu0 %vm446_vm0, %v1704_v59  ;;  %1471 = vmatprep.mubr.msk.bf16.mxu1 %vm446_vm0, %v1706_v60 }
  0x81   :  { %671 = vmatmul.mubr.bf16.gmra.mrb[44].mxu0 %v1708_v61  ;;  %799 = vmatmul.mubr.bf16.gmra.mrb[44].mxu1 %v1709_v62 }
  0x82   :  { %1456 = vmatprep.mubr.msk.bf16.mxu0 %vm446_vm0, %v1710_v63  ;;  %1472 = vmatprep.mubr.msk.bf16.mxu1 %vm446_vm0, %v1712_v0 }
  0x89   :  { %679 = vmatmul.mubr.bf16.gmra.mrb[48].mxu0 %v1714_v1  ;;  %807 = vmatmul.mubr.bf16.gmra.mrb[48].mxu1 %v1715_v2 }
  0x8a   :  { %1457 = vmatprep.mubr.msk.bf16.mxu0 %vm446_vm0, %v1716_v3  ;;  %1473 = vmatprep.mubr.msk.bf16.mxu1 %vm446_vm0, %v1718_v4 }
  0x91   :  { %687 = vmatmul.mubr.bf16.gmra.mrb[52].mxu0 %v1720_v5  ;;  %815 = vmatmul.mubr.bf16.gmra.mrb[52].mxu1 %v1721_v6 }
  0x92   :  { %1458 = vmatprep.mubr.msk.bf16.mxu0 %vm446_vm0, %v1722_v7  ;;  %1474 = vmatprep.mubr.msk.bf16.mxu1 %vm446_vm0, %v1724_v8 }
  0x99   :  { %695 = vmatmul.mubr.bf16.gmra.mrb[56].mxu0 %v1726_v9  ;;  %823 = vmatmul.mubr.bf16.gmra.mrb[56].mxu1 %v1727_v10 }
  0x9a   :  { %1459 = vmatprep.mubr.msk.bf16.mxu0 %vm446_vm0, %v1728_v11  ;;  %1475 = vmatprep.mubr.msk.bf16.mxu1 %vm446_vm0, %v1730_v12 }
  0xa1   :  { %703 = vmatmul.mubr.bf16.gmra.mrb[60].mxu0 %v1732_v13  ;;  %831 = vmatmul.mubr.bf16.gmra.mrb[60].mxu1 %v1733_v14 }
  0xfc   :  { %v584_v16 = vpop.f32.mrb[0].mxu0  ;;  %v712_v18 = vpop.f32.mrb[0].mxu1 }
  0xfd   :  { %v846_v19 = vmul.f32 %v2018_v15, %v584_v16  ;;  %v878_v20 = vmul.f32 %v2018_v15, %v712_v18  ;;  %v586_v21 = vpop.f32.mrb[1].mxu0  ;;  %v714_v22 = vpop.f32.mrb[1].mxu1 }
  0xfe   :  { %v587_v23 = vpop.f32.mrb[2].mxu0  ;;  %v715_v24 = vpop.f32.mrb[2].mxu1 }
  0xff   :  { %v917_v25 = vadd.f32 %v2023_v17, %v846_v19  ;;  %v949_v26 = vadd.f32 %v2023_v17, %v878_v20  ;;  %v847_v27 = vmul.f32 %v2018_v15, %v587_v23  ;;  %v879_v28 = vmul.f32 %v2018_v15, %v715_v24  ;;  %v589_v29 = vpop.f32.mrb[3].mxu0  ;;  %v717_v30 = vpop.f32.mrb[3].mxu1 }
 0x101   :  { %v981_v31 = vmax.f32 %v917_v25, 0.0  ;;  %v1013_v32 = vmax.f32 %v949_v26, 0.0  ;;  %v918_v33 = vadd.f32 %v2023_v17, %v847_v27  ;;  %v950_v34 = vadd.f32 %v2023_v17, %v879_v28 }
 0x103   :  { %v1542_v35 = vpack.c.bf16 %v981_v31, %v981_v31  ;;  %v1574_v36 = vpack.c.bf16 %v1013_v32, %v1013_v32  ;;  %v982_v37 = vmax.f32 %v918_v33, 0.0  ;;  %v1014_v38 = vmax.f32 %v950_v34, 0.0 }
 0x104   :  { %v592_v39 = vpop.f32.mrb[4].mxu0  ;;  %v720_v40 = vpop.f32.mrb[4].mxu1 }
 0x105   :  { %1302 = vst.msk [vmem:[%s2413_s4] sm:$0xf] %vm1301_vm3, %v1542_v35  ;;  %1334 = vst.msk [vmem:[%s2413_s4 + $0x80] sm:$0xf] %vm1301_vm3, %v1574_v36  ;;  %v1543_v41 = vpack.c.bf16 %v982_v37, %v982_v37  ;;  %v1575_v42 = vpack.c.bf16 %v1014_v38, %v1014_v38  ;;  %v848_v43 = vmul.f32 %v2018_v15, %v592_v39  ;;  %v594_v45 = vpop.f32.mrb[5].mxu0  ;;  %v722_v46 = vpop.f32.mrb[5].mxu1 }
 0x106   :  { %v880_v44 = vmul.f32 %v2018_v15, %v720_v40  ;;  %v595_v47 = vpop.f32.mrb[6].mxu0  ;;  %v723_v48 = vpop.f32.mrb[6].mxu1 }
 0x107   :  { %1303 = vst.msk [vmem:[%s2413_s4 + $0x4] sm:$0xf] %vm1301_vm3, %v1543_v41  ;;  %1335 = vst.msk [vmem:[%s2413_s4 + $0x84] sm:$0xf] %vm1301_vm3, %v1575_v42  ;;  %v919_v49 = vadd.f32 %v2023_v17, %v848_v43  ;;  %v849_v51 = vmul.f32 %v2018_v15, %v595_v47  ;;  %v881_v52 = vmul.f32 %v2018_v15, %v723_v48  ;;  %v597_v53 = vpop.f32.mrb[7].mxu0  ;;  %v725_v54 = vpop.f32.mrb[7].mxu1 }
 0x108   :  { %v951_v50 = vadd.f32 %v2023_v17, %v880_v44 }
 0x109   :  { %v983_v55 = vmax.f32 %v919_v49, 0.0  ;;  %v920_v57 = vadd.f32 %v2023_v17, %v849_v51  ;;  %v952_v58 = vadd.f32 %v2023_v17, %v881_v52 }
 0x10a   :  { %v1015_v56 = vmax.f32 %v951_v50, 0.0 }
 0x10b   :  { %v1544_v59 = vpack.c.bf16 %v983_v55, %v983_v55  ;;  %v984_v61 = vmax.f32 %v920_v57, 0.0  ;;  %v1016_v62 = vmax.f32 %v952_v58, 0.0 }
 0x10c   :  { %v1576_v60 = vpack.c.bf16 %v1015_v56, %v1015_v56  ;;  %v600_v63 = vpop.f32.mrb[8].mxu0  ;;  %v728_v0 = vpop.f32.mrb[8].mxu1 }
 0x10d   :  { %1304 = vst.msk [vmem:[%s2413_s4 + $0x8] sm:$0xf] %vm1301_vm3, %v1544_v59  ;;  %v1545_v1 = vpack.c.bf16 %v984_v61, %v984_v61  ;;  %v1577_v2 = vpack.c.bf16 %v1016_v62, %v1016_v62  ;;  %v850_v3 = vmul.f32 %v2018_v15, %v600_v63  ;;  %v882_v4 = vmul.f32 %v2018_v15, %v728_v0  ;;  %v602_v5 = vpop.f32.mrb[9].mxu0  ;;  %v730_v6 = vpop.f32.mrb[9].mxu1 }
 0x10e   :  { %1336 = vst.msk [vmem:[%s2413_s4 + $0x88] sm:$0xf] %vm1301_vm3, %v1576_v60  ;;  %v603_v7 = vpop.f32.mrb[10].mxu0  ;;  %v731_v8 = vpop.f32.mrb[10].mxu1 }
 0x10f   :  { %1305 = vst.msk [vmem:[%s2413_s4 + $0xc] sm:$0xf] %vm1301_vm3, %v1545_v1  ;;  %1337 = vst.msk [vmem:[%s2413_s4 + $0x8c] sm:$0xf] %vm1301_vm3, %v1577_v2  ;;  %v921_v9 = vadd.f32 %v2023_v17, %v850_v3  ;;  %v953_v10 = vadd.f32 %v2023_v17, %v882_v4  ;;  %v851_v11 = vmul.f32 %v2018_v15, %v603_v7  ;;  %v605_v13 = vpop.f32.mrb[11].mxu0  ;;  %v733_v14 = vpop.f32.mrb[11].mxu1 }
 0x110   :  { %v883_v12 = vmul.f32 %v2018_v15, %v731_v8 }
 0x111   :  { %v985_v16 = vmax.f32 %v921_v9, 0.0  ;;  %v1017_v18 = vmax.f32 %v953_v10, 0.0  ;;  %v922_v19 = vadd.f32 %v2023_v17, %v851_v11 }
 0x112   :  { %v954_v20 = vadd.f32 %v2023_v17, %v883_v12 }
 0x113   :  { %v1546_v21 = vpack.c.bf16 %v985_v16, %v985_v16  ;;  %v1578_v22 = vpack.c.bf16 %v1017_v18, %v1017_v18  ;;  %v986_v23 = vmax.f32 %v922_v19, 0.0 }
 0x114   :  { %v1018_v24 = vmax.f32 %v954_v20, 0.0  ;;  %v608_v25 = vpop.f32.mrb[12].mxu0  ;;  %v736_v26 = vpop.f32.mrb[12].mxu1 }
 0x115   :  { %1306 = vst.msk [vmem:[%s2413_s4 + $0x10] sm:$0xf] %vm1301_vm3, %v1546_v21  ;;  %1338 = vst.msk [vmem:[%s2413_s4 + $0x90] sm:$0xf] %vm1301_vm3, %v1578_v22  ;;  %v1547_v27 = vpack.c.bf16 %v986_v23, %v986_v23  ;;  %v852_v29 = vmul.f32 %v2018_v15, %v608_v25  ;;  %v884_v30 = vmul.f32 %v2018_v15, %v736_v26  ;;  %v610_v31 = vpop.f32.mrb[13].mxu0  ;;  %v738_v32 = vpop.f32.mrb[13].mxu1 }
 0x116   :  { %v1579_v28 = vpack.c.bf16 %v1018_v24, %v1018_v24  ;;  %v611_v33 = vpop.f32.mrb[14].mxu0  ;;  %v739_v34 = vpop.f32.mrb[14].mxu1 }
 0x117   :  { %1307 = vst.msk [vmem:[%s2413_s4 + $0x14] sm:$0xf] %vm1301_vm3, %v1547_v27  ;;  %v923_v35 = vadd.f32 %v2023_v17, %v852_v29  ;;  %v955_v36 = vadd.f32 %v2023_v17, %v884_v30  ;;  %v853_v37 = vmul.f32 %v2018_v15, %v611_v33  ;;  %v885_v38 = vmul.f32 %v2018_v15, %v739_v34  ;;  %v613_v39 = vpop.f32.mrb[15].mxu0  ;;  %v741_v40 = vpop.f32.mrb[15].mxu1 }
 0x118   :  { %1339 = vst.msk [vmem:[%s2413_s4 + $0x94] sm:$0xf] %vm1301_vm3, %v1579_v28 }
 0x119   :  { %v987_v41 = vmax.f32 %v923_v35, 0.0  ;;  %v1019_v42 = vmax.f32 %v955_v36, 0.0  ;;  %v924_v43 = vadd.f32 %v2023_v17, %v853_v37  ;;  %v956_v44 = vadd.f32 %v2023_v17, %v885_v38 }
 0x11b   :  { %v1548_v45 = vpack.c.bf16 %v987_v41, %v987_v41  ;;  %v1580_v46 = vpack.c.bf16 %v1019_v42, %v1019_v42  ;;  %v988_v47 = vmax.f32 %v924_v43, 0.0  ;;  %v1020_v48 = vmax.f32 %v956_v44, 0.0 }
 0x11c   :  { %v616_v49 = vpop.f32.mrb[16].mxu0  ;;  %v744_v50 = vpop.f32.mrb[16].mxu1 }
 0x11d   :  { %1308 = vst.msk [vmem:[%s2413_s4 + $0x18] sm:$0xf] %vm1301_vm3, %v1548_v45  ;;  %1340 = vst.msk [vmem:[%s2413_s4 + $0x98] sm:$0xf] %vm1301_vm3, %v1580_v46  ;;  %v1549_v51 = vpack.c.bf16 %v988_v47, %v988_v47  ;;  %v1581_v52 = vpack.c.bf16 %v1020_v48, %v1020_v48  ;;  %v854_v53 = vmul.f32 %v2018_v15, %v616_v49  ;;  %v618_v55 = vpop.f32.mrb[17].mxu0  ;;  %v746_v56 = vpop.f32.mrb[17].mxu1 }
 0x11e   :  { %v886_v54 = vmul.f32 %v2018_v15, %v744_v50  ;;  %v619_v57 = vpop.f32.mrb[18].mxu0  ;;  %v747_v58 = vpop.f32.mrb[18].mxu1 }
 0x11f   :  { %1309 = vst.msk [vmem:[%s2413_s4 + $0x1c] sm:$0xf] %vm1301_vm3, %v1549_v51  ;;  %1341 = vst.msk [vmem:[%s2413_s4 + $0x9c] sm:$0xf] %vm1301_vm3, %v1581_v52  ;;  %v925_v59 = vadd.f32 %v2023_v17, %v854_v53  ;;  %v855_v61 = vmul.f32 %v2018_v15, %v619_v57  ;;  %v887_v62 = vmul.f32 %v2018_v15, %v747_v58  ;;  %v621_v63 = vpop.f32.mrb[19].mxu0  ;;  %v749_v0 = vpop.f32.mrb[19].mxu1 }
 0x120   :  { %v957_v60 = vadd.f32 %v2023_v17, %v886_v54 }
 0x121   :  { %v989_v1 = vmax.f32 %v925_v59, 0.0  ;;  %v926_v3 = vadd.f32 %v2023_v17, %v855_v61  ;;  %v958_v4 = vadd.f32 %v2023_v17, %v887_v62 }
 0x122   :  { %v1021_v2 = vmax.f32 %v957_v60, 0.0 }
 0x123   :  { %v1550_v5 = vpack.c.bf16 %v989_v1, %v989_v1  ;;  %v990_v7 = vmax.f32 %v926_v3, 0.0  ;;  %v1022_v8 = vmax.f32 %v958_v4, 0.0 }
 0x124   :  { %v1582_v6 = vpack.c.bf16 %v1021_v2, %v1021_v2  ;;  %v624_v9 = vpop.f32.mrb[20].mxu0  ;;  %v752_v10 = vpop.f32.mrb[20].mxu1 }
 0x125   :  { %1310 = vst.msk [vmem:[%s2413_s4 + $0x20] sm:$0xf] %vm1301_vm3, %v1550_v5  ;;  %v1551_v11 = vpack.c.bf16 %v990_v7, %v990_v7  ;;  %v1583_v12 = vpack.c.bf16 %v1022_v8, %v1022_v8  ;;  %v856_v13 = vmul.f32 %v2018_v15, %v624_v9  ;;  %v888_v14 = vmul.f32 %v2018_v15, %v752_v10  ;;  %v626_v16 = vpop.f32.mrb[21].mxu0  ;;  %v754_v18 = vpop.f32.mrb[21].mxu1 }
 0x126   :  { %1342 = vst.msk [vmem:[%s2413_s4 + $0xa0] sm:$0xf] %vm1301_vm3, %v1582_v6  ;;  %v627_v19 = vpop.f32.mrb[22].mxu0  ;;  %v755_v20 = vpop.f32.mrb[22].mxu1 }
 0x127   :  { %1311 = vst.msk [vmem:[%s2413_s4 + $0x24] sm:$0xf] %vm1301_vm3, %v1551_v11  ;;  %1343 = vst.msk [vmem:[%s2413_s4 + $0xa4] sm:$0xf] %vm1301_vm3, %v1583_v12  ;;  %v927_v21 = vadd.f32 %v2023_v17, %v856_v13  ;;  %v959_v22 = vadd.f32 %v2023_v17, %v888_v14  ;;  %v857_v23 = vmul.f32 %v2018_v15, %v627_v19  ;;  %v629_v25 = vpop.f32.mrb[23].mxu0  ;;  %v757_v26 = vpop.f32.mrb[23].mxu1 }
 0x128   :  { %v889_v24 = vmul.f32 %v2018_v15, %v755_v20 }
 0x129   :  { %v991_v27 = vmax.f32 %v927_v21, 0.0  ;;  %v1023_v28 = vmax.f32 %v959_v22, 0.0  ;;  %v928_v29 = vadd.f32 %v2023_v17, %v857_v23 }
 0x12a   :  { %v960_v30 = vadd.f32 %v2023_v17, %v889_v24 }
 0x12b   :  { %v1552_v31 = vpack.c.bf16 %v991_v27, %v991_v27  ;;  %v1584_v32 = vpack.c.bf16 %v1023_v28, %v1023_v28  ;;  %v992_v33 = vmax.f32 %v928_v29, 0.0 }
 0x12c   :  { %v1024_v34 = vmax.f32 %v960_v30, 0.0  ;;  %v632_v35 = vpop.f32.mrb[24].mxu0  ;;  %v760_v36 = vpop.f32.mrb[24].mxu1 }
 0x12d   :  { %1312 = vst.msk [vmem:[%s2413_s4 + $0x28] sm:$0xf] %vm1301_vm3, %v1552_v31  ;;  %1344 = vst.msk [vmem:[%s2413_s4 + $0xa8] sm:$0xf] %vm1301_vm3, %v1584_v32  ;;  %v1553_v37 = vpack.c.bf16 %v992_v33, %v992_v33  ;;  %v858_v39 = vmul.f32 %v2018_v15, %v632_v35  ;;  %v890_v40 = vmul.f32 %v2018_v15, %v760_v36  ;;  %v634_v41 = vpop.f32.mrb[25].mxu0  ;;  %v762_v42 = vpop.f32.mrb[25].mxu1 }
 0x12e   :  { %v1585_v38 = vpack.c.bf16 %v1024_v34, %v1024_v34  ;;  %v635_v43 = vpop.f32.mrb[26].mxu0  ;;  %v763_v44 = vpop.f32.mrb[26].mxu1 }
 0x12f   :  { %1313 = vst.msk [vmem:[%s2413_s4 + $0x2c] sm:$0xf] %vm1301_vm3, %v1553_v37  ;;  %v929_v45 = vadd.f32 %v2023_v17, %v858_v39  ;;  %v961_v46 = vadd.f32 %v2023_v17, %v890_v40  ;;  %v859_v47 = vmul.f32 %v2018_v15, %v635_v43  ;;  %v891_v48 = vmul.f32 %v2018_v15, %v763_v44  ;;  %v637_v49 = vpop.f32.mrb[27].mxu0  ;;  %v765_v50 = vpop.f32.mrb[27].mxu1 }
 0x130   :  { %1345 = vst.msk [vmem:[%s2413_s4 + $0xac] sm:$0xf] %vm1301_vm3, %v1585_v38 }
 0x131   :  { %v993_v51 = vmax.f32 %v929_v45, 0.0  ;;  %v1025_v52 = vmax.f32 %v961_v46, 0.0  ;;  %v930_v53 = vadd.f32 %v2023_v17, %v859_v47  ;;  %v962_v54 = vadd.f32 %v2023_v17, %v891_v48 }
 0x133   :  { %v1554_v55 = vpack.c.bf16 %v993_v51, %v993_v51  ;;  %v1586_v56 = vpack.c.bf16 %v1025_v52, %v1025_v52  ;;  %v994_v57 = vmax.f32 %v930_v53, 0.0  ;;  %v1026_v58 = vmax.f32 %v962_v54, 0.0 }
 0x134   :  { %v640_v59 = vpop.f32.mrb[28].mxu0  ;;  %v768_v60 = vpop.f32.mrb[28].mxu1 }
 0x135   :  { %1314 = vst.msk [vmem:[%s2413_s4 + $0x30] sm:$0xf] %vm1301_vm3, %v1554_v55  ;;  %1346 = vst.msk [vmem:[%s2413_s4 + $0xb0] sm:$0xf] %vm1301_vm3, %v1586_v56  ;;  %v1555_v61 = vpack.c.bf16 %v994_v57, %v994_v57  ;;  %v1587_v62 = vpack.c.bf16 %v1026_v58, %v1026_v58  ;;  %v860_v63 = vmul.f32 %v2018_v15, %v640_v59  ;;  %v642_v1 = vpop.f32.mrb[29].mxu0  ;;  %v770_v2 = vpop.f32.mrb[29].mxu1 }
 0x136   :  { %v892_v0 = vmul.f32 %v2018_v15, %v768_v60  ;;  %v643_v3 = vpop.f32.mrb[30].mxu0  ;;  %v771_v4 = vpop.f32.mrb[30].mxu1 }
 0x137   :  { %1315 = vst.msk [vmem:[%s2413_s4 + $0x34] sm:$0xf] %vm1301_vm3, %v1555_v61  ;;  %1347 = vst.msk [vmem:[%s2413_s4 + $0xb4] sm:$0xf] %vm1301_vm3, %v1587_v62  ;;  %v931_v5 = vadd.f32 %v2023_v17, %v860_v63  ;;  %v861_v7 = vmul.f32 %v2018_v15, %v643_v3  ;;  %v893_v8 = vmul.f32 %v2018_v15, %v771_v4  ;;  %v645_v9 = vpop.f32.mrb[31].mxu0  ;;  %v773_v10 = vpop.f32.mrb[31].mxu1 }
 0x138   :  { %v963_v6 = vadd.f32 %v2023_v17, %v892_v0 }
 0x139   :  { %v995_v11 = vmax.f32 %v931_v5, 0.0  ;;  %v932_v13 = vadd.f32 %v2023_v17, %v861_v7  ;;  %v964_v14 = vadd.f32 %v2023_v17, %v893_v8 }
 0x13a   :  { %v1027_v12 = vmax.f32 %v963_v6, 0.0 }
 0x13b   :  { %v1556_v16 = vpack.c.bf16 %v995_v11, %v995_v11  ;;  %v996_v19 = vmax.f32 %v932_v13, 0.0  ;;  %v1028_v20 = vmax.f32 %v964_v14, 0.0 }
 0x13c   :  { %v1588_v18 = vpack.c.bf16 %v1027_v12, %v1027_v12  ;;  %v648_v21 = vpop.f32.mrb[32].mxu0  ;;  %v776_v22 = vpop.f32.mrb[32].mxu1 }
 0x13d   :  { %1316 = vst.msk [vmem:[%s2413_s4 + $0x38] sm:$0xf] %vm1301_vm3, %v1556_v16  ;;  %v1557_v23 = vpack.c.bf16 %v996_v19, %v996_v19  ;;  %v1589_v24 = vpack.c.bf16 %v1028_v20, %v1028_v20  ;;  %v862_v25 = vmul.f32 %v2018_v15, %v648_v21  ;;  %v894_v26 = vmul.f32 %v2018_v15, %v776_v22  ;;  %v650_v27 = vpop.f32.mrb[33].mxu0  ;;  %v778_v28 = vpop.f32.mrb[33].mxu1 }
 0x13e   :  { %1348 = vst.msk [vmem:[%s2413_s4 + $0xb8] sm:$0xf] %vm1301_vm3, %v1588_v18  ;;  %v651_v29 = vpop.f32.mrb[34].mxu0  ;;  %v779_v30 = vpop.f32.mrb[34].mxu1 }
 0x13f   :  { %1317 = vst.msk [vmem:[%s2413_s4 + $0x3c] sm:$0xf] %vm1301_vm3, %v1557_v23  ;;  %1349 = vst.msk [vmem:[%s2413_s4 + $0xbc] sm:$0xf] %vm1301_vm3, %v1589_v24  ;;  %v933_v31 = vadd.f32 %v2023_v17, %v862_v25  ;;  %v965_v32 = vadd.f32 %v2023_v17, %v894_v26  ;;  %v863_v33 = vmul.f32 %v2018_v15, %v651_v29  ;;  %v653_v35 = vpop.f32.mrb[35].mxu0  ;;  %v781_v36 = vpop.f32.mrb[35].mxu1 }
 0x140   :  { %v895_v34 = vmul.f32 %v2018_v15, %v779_v30 }
 0x141   :  { %v997_v37 = vmax.f32 %v933_v31, 0.0  ;;  %v1029_v38 = vmax.f32 %v965_v32, 0.0  ;;  %v934_v39 = vadd.f32 %v2023_v17, %v863_v33 }
 0x142   :  { %v966_v40 = vadd.f32 %v2023_v17, %v895_v34 }
 0x143   :  { %v1558_v41 = vpack.c.bf16 %v997_v37, %v997_v37  ;;  %v1590_v42 = vpack.c.bf16 %v1029_v38, %v1029_v38  ;;  %v998_v43 = vmax.f32 %v934_v39, 0.0 }
 0x144   :  { %v1030_v44 = vmax.f32 %v966_v40, 0.0  ;;  %v656_v45 = vpop.f32.mrb[36].mxu0  ;;  %v784_v46 = vpop.f32.mrb[36].mxu1 }
 0x145   :  { %1318 = vst.msk [vmem:[%s2413_s4 + $0x40] sm:$0xf] %vm1301_vm3, %v1558_v41  ;;  %1350 = vst.msk [vmem:[%s2413_s4 + $0xc0] sm:$0xf] %vm1301_vm3, %v1590_v42  ;;  %v1559_v47 = vpack.c.bf16 %v998_v43, %v998_v43  ;;  %v864_v49 = vmul.f32 %v2018_v15, %v656_v45  ;;  %v896_v50 = vmul.f32 %v2018_v15, %v784_v46  ;;  %v658_v51 = vpop.f32.mrb[37].mxu0  ;;  %v786_v52 = vpop.f32.mrb[37].mxu1 }
 0x146   :  { %v1591_v48 = vpack.c.bf16 %v1030_v44, %v1030_v44  ;;  %v659_v53 = vpop.f32.mrb[38].mxu0  ;;  %v787_v54 = vpop.f32.mrb[38].mxu1 }
 0x147   :  { %1319 = vst.msk [vmem:[%s2413_s4 + $0x44] sm:$0xf] %vm1301_vm3, %v1559_v47  ;;  %v935_v55 = vadd.f32 %v2023_v17, %v864_v49  ;;  %v967_v56 = vadd.f32 %v2023_v17, %v896_v50  ;;  %v865_v57 = vmul.f32 %v2018_v15, %v659_v53  ;;  %v897_v58 = vmul.f32 %v2018_v15, %v787_v54  ;;  %v661_v59 = vpop.f32.mrb[39].mxu0  ;;  %v789_v60 = vpop.f32.mrb[39].mxu1 }
 0x148   :  { %1351 = vst.msk [vmem:[%s2413_s4 + $0xc4] sm:$0xf] %vm1301_vm3, %v1591_v48 }
 0x149   :  { %v999_v61 = vmax.f32 %v935_v55, 0.0  ;;  %v1031_v62 = vmax.f32 %v967_v56, 0.0  ;;  %v936_v63 = vadd.f32 %v2023_v17, %v865_v57  ;;  %v968_v0 = vadd.f32 %v2023_v17, %v897_v58 }
 0x14b   :  { %v1560_v1 = vpack.c.bf16 %v999_v61, %v999_v61  ;;  %v1592_v2 = vpack.c.bf16 %v1031_v62, %v1031_v62  ;;  %v1000_v3 = vmax.f32 %v936_v63, 0.0  ;;  %v1032_v4 = vmax.f32 %v968_v0, 0.0 }
 0x14c   :  { %v664_v5 = vpop.f32.mrb[40].mxu0  ;;  %v792_v6 = vpop.f32.mrb[40].mxu1 }
 0x14d   :  { %1320 = vst.msk [vmem:[%s2413_s4 + $0x48] sm:$0xf] %vm1301_vm3, %v1560_v1  ;;  %1352 = vst.msk [vmem:[%s2413_s4 + $0xc8] sm:$0xf] %vm1301_vm3, %v1592_v2  ;;  %v1561_v7 = vpack.c.bf16 %v1000_v3, %v1000_v3  ;;  %v1593_v8 = vpack.c.bf16 %v1032_v4, %v1032_v4  ;;  %v866_v9 = vmul.f32 %v2018_v15, %v664_v5  ;;  %v666_v11 = vpop.f32.mrb[41].mxu0  ;;  %v794_v12 = vpop.f32.mrb[41].mxu1 }
 0x14e   :  { %v898_v10 = vmul.f32 %v2018_v15, %v792_v6  ;;  %v667_v13 = vpop.f32.mrb[42].mxu0  ;;  %v795_v14 = vpop.f32.mrb[42].mxu1 }
 0x14f   :  { %1321 = vst.msk [vmem:[%s2413_s4 + $0x4c] sm:$0xf] %vm1301_vm3, %v1561_v7  ;;  %1353 = vst.msk [vmem:[%s2413_s4 + $0xcc] sm:$0xf] %vm1301_vm3, %v1593_v8  ;;  %v937_v16 = vadd.f32 %v2023_v17, %v866_v9  ;;  %v867_v19 = vmul.f32 %v2018_v15, %v667_v13  ;;  %v899_v20 = vmul.f32 %v2018_v15, %v795_v14  ;;  %v669_v21 = vpop.f32.mrb[43].mxu0  ;;  %v797_v22 = vpop.f32.mrb[43].mxu1 }
 0x150   :  { %v969_v18 = vadd.f32 %v2023_v17, %v898_v10 }
 0x151   :  { %v1001_v23 = vmax.f32 %v937_v16, 0.0  ;;  %v938_v25 = vadd.f32 %v2023_v17, %v867_v19  ;;  %v970_v26 = vadd.f32 %v2023_v17, %v899_v20 }
 0x152   :  { %v1033_v24 = vmax.f32 %v969_v18, 0.0 }
 0x153   :  { %v1562_v27 = vpack.c.bf16 %v1001_v23, %v1001_v23  ;;  %v1002_v29 = vmax.f32 %v938_v25, 0.0  ;;  %v1034_v30 = vmax.f32 %v970_v26, 0.0 }
 0x154   :  { %v1594_v28 = vpack.c.bf16 %v1033_v24, %v1033_v24  ;;  %v672_v31 = vpop.f32.mrb[44].mxu0  ;;  %v800_v32 = vpop.f32.mrb[44].mxu1 }
 0x155   :  { %1322 = vst.msk [vmem:[%s2413_s4 + $0x50] sm:$0xf] %vm1301_vm3, %v1562_v27  ;;  %v1563_v33 = vpack.c.bf16 %v1002_v29, %v1002_v29  ;;  %v1595_v34 = vpack.c.bf16 %v1034_v30, %v1034_v30  ;;  %v868_v35 = vmul.f32 %v2018_v15, %v672_v31  ;;  %v900_v36 = vmul.f32 %v2018_v15, %v800_v32  ;;  %v674_v37 = vpop.f32.mrb[45].mxu0  ;;  %v802_v38 = vpop.f32.mrb[45].mxu1 }
 0x156   :  { %1354 = vst.msk [vmem:[%s2413_s4 + $0xd0] sm:$0xf] %vm1301_vm3, %v1594_v28  ;;  %v675_v39 = vpop.f32.mrb[46].mxu0  ;;  %v803_v40 = vpop.f32.mrb[46].mxu1 }
 0x157   :  { %1323 = vst.msk [vmem:[%s2413_s4 + $0x54] sm:$0xf] %vm1301_vm3, %v1563_v33  ;;  %1355 = vst.msk [vmem:[%s2413_s4 + $0xd4] sm:$0xf] %vm1301_vm3, %v1595_v34  ;;  %v939_v41 = vadd.f32 %v2023_v17, %v868_v35  ;;  %v971_v42 = vadd.f32 %v2023_v17, %v900_v36  ;;  %v869_v43 = vmul.f32 %v2018_v15, %v675_v39  ;;  %v677_v45 = vpop.f32.mrb[47].mxu0  ;;  %v805_v46 = vpop.f32.mrb[47].mxu1 }
 0x158   :  { %v901_v44 = vmul.f32 %v2018_v15, %v803_v40 }
 0x159   :  { %v1003_v47 = vmax.f32 %v939_v41, 0.0  ;;  %v1035_v48 = vmax.f32 %v971_v42, 0.0  ;;  %v940_v49 = vadd.f32 %v2023_v17, %v869_v43 }
 0x15a   :  { %v972_v50 = vadd.f32 %v2023_v17, %v901_v44 }
 0x15b   :  { %v1564_v51 = vpack.c.bf16 %v1003_v47, %v1003_v47  ;;  %v1596_v52 = vpack.c.bf16 %v1035_v48, %v1035_v48  ;;  %v1004_v53 = vmax.f32 %v940_v49, 0.0 }
 0x15c   :  { %v1036_v54 = vmax.f32 %v972_v50, 0.0  ;;  %v680_v55 = vpop.f32.mrb[48].mxu0  ;;  %v808_v56 = vpop.f32.mrb[48].mxu1 }
 0x15d   :  { %1324 = vst.msk [vmem:[%s2413_s4 + $0x58] sm:$0xf] %vm1301_vm3, %v1564_v51  ;;  %1356 = vst.msk [vmem:[%s2413_s4 + $0xd8] sm:$0xf] %vm1301_vm3, %v1596_v52  ;;  %v1565_v57 = vpack.c.bf16 %v1004_v53, %v1004_v53  ;;  %v870_v59 = vmul.f32 %v2018_v15, %v680_v55  ;;  %v902_v60 = vmul.f32 %v2018_v15, %v808_v56  ;;  %v682_v61 = vpop.f32.mrb[49].mxu0  ;;  %v810_v62 = vpop.f32.mrb[49].mxu1 }
 0x15e   :  { %v1597_v58 = vpack.c.bf16 %v1036_v54, %v1036_v54  ;;  %v683_v63 = vpop.f32.mrb[50].mxu0  ;;  %v811_v0 = vpop.f32.mrb[50].mxu1 }
 0x15f   :  { %1325 = vst.msk [vmem:[%s2413_s4 + $0x5c] sm:$0xf] %vm1301_vm3, %v1565_v57  ;;  %v941_v1 = vadd.f32 %v2023_v17, %v870_v59  ;;  %v973_v2 = vadd.f32 %v2023_v17, %v902_v60  ;;  %v871_v3 = vmul.f32 %v2018_v15, %v683_v63  ;;  %v903_v4 = vmul.f32 %v2018_v15, %v811_v0  ;;  %v685_v5 = vpop.f32.mrb[51].mxu0  ;;  %v813_v6 = vpop.f32.mrb[51].mxu1 }
 0x160   :  { %1357 = vst.msk [vmem:[%s2413_s4 + $0xdc] sm:$0xf] %vm1301_vm3, %v1597_v58 }
 0x161   :  { %v1005_v7 = vmax.f32 %v941_v1, 0.0  ;;  %v1037_v8 = vmax.f32 %v973_v2, 0.0  ;;  %v942_v9 = vadd.f32 %v2023_v17, %v871_v3  ;;  %v974_v10 = vadd.f32 %v2023_v17, %v903_v4 }
 0x163   :  { %v1566_v11 = vpack.c.bf16 %v1005_v7, %v1005_v7  ;;  %v1598_v12 = vpack.c.bf16 %v1037_v8, %v1037_v8  ;;  %v1006_v13 = vmax.f32 %v942_v9, 0.0  ;;  %v1038_v14 = vmax.f32 %v974_v10, 0.0 }
 0x164   :  { %v688_v16 = vpop.f32.mrb[52].mxu0  ;;  %v816_v18 = vpop.f32.mrb[52].mxu1 }
 0x165   :  { %1326 = vst.msk [vmem:[%s2413_s4 + $0x60] sm:$0xf] %vm1301_vm3, %v1566_v11  ;;  %1358 = vst.msk [vmem:[%s2413_s4 + $0xe0] sm:$0xf] %vm1301_vm3, %v1598_v12  ;;  %v1567_v19 = vpack.c.bf16 %v1006_v13, %v1006_v13  ;;  %v1599_v20 = vpack.c.bf16 %v1038_v14, %v1038_v14  ;;  %v872_v21 = vmul.f32 %v2018_v15, %v688_v16  ;;  %v690_v23 = vpop.f32.mrb[53].mxu0  ;;  %v818_v24 = vpop.f32.mrb[53].mxu1 }
 0x166   :  { %v904_v22 = vmul.f32 %v2018_v15, %v816_v18  ;;  %v691_v25 = vpop.f32.mrb[54].mxu0  ;;  %v819_v26 = vpop.f32.mrb[54].mxu1 }
 0x167   :  { %1327 = vst.msk [vmem:[%s2413_s4 + $0x64] sm:$0xf] %vm1301_vm3, %v1567_v19  ;;  %1359 = vst.msk [vmem:[%s2413_s4 + $0xe4] sm:$0xf] %vm1301_vm3, %v1599_v20  ;;  %v943_v27 = vadd.f32 %v2023_v17, %v872_v21  ;;  %v873_v29 = vmul.f32 %v2018_v15, %v691_v25  ;;  %v905_v30 = vmul.f32 %v2018_v15, %v819_v26  ;;  %v693_v31 = vpop.f32.mrb[55].mxu0  ;;  %v821_v32 = vpop.f32.mrb[55].mxu1 }
 0x168   :  { %v975_v28 = vadd.f32 %v2023_v17, %v904_v22 }
 0x169   :  { %v1007_v33 = vmax.f32 %v943_v27, 0.0  ;;  %v944_v35 = vadd.f32 %v2023_v17, %v873_v29  ;;  %v976_v36 = vadd.f32 %v2023_v17, %v905_v30 }
 0x16a   :  { %v1039_v34 = vmax.f32 %v975_v28, 0.0 }
 0x16b   :  { %v1568_v37 = vpack.c.bf16 %v1007_v33, %v1007_v33  ;;  %v1008_v39 = vmax.f32 %v944_v35, 0.0  ;;  %v1040_v40 = vmax.f32 %v976_v36, 0.0 }
 0x16c   :  { %v1600_v38 = vpack.c.bf16 %v1039_v34, %v1039_v34  ;;  %v696_v41 = vpop.f32.mrb[56].mxu0  ;;  %v824_v42 = vpop.f32.mrb[56].mxu1 }
 0x16d   :  { %1328 = vst.msk [vmem:[%s2413_s4 + $0x68] sm:$0xf] %vm1301_vm3, %v1568_v37  ;;  %v1569_v43 = vpack.c.bf16 %v1008_v39, %v1008_v39  ;;  %v1601_v44 = vpack.c.bf16 %v1040_v40, %v1040_v40  ;;  %v874_v45 = vmul.f32 %v2018_v15, %v696_v41  ;;  %v906_v46 = vmul.f32 %v2018_v15, %v824_v42  ;;  %v698_v47 = vpop.f32.mrb[57].mxu0  ;;  %v826_v48 = vpop.f32.mrb[57].mxu1 }
 0x16e   :  { %1360 = vst.msk [vmem:[%s2413_s4 + $0xe8] sm:$0xf] %vm1301_vm3, %v1600_v38  ;;  %v699_v49 = vpop.f32.mrb[58].mxu0  ;;  %v827_v50 = vpop.f32.mrb[58].mxu1 }
 0x16f   :  { %1329 = vst.msk [vmem:[%s2413_s4 + $0x6c] sm:$0xf] %vm1301_vm3, %v1569_v43  ;;  %1361 = vst.msk [vmem:[%s2413_s4 + $0xec] sm:$0xf] %vm1301_vm3, %v1601_v44  ;;  %v945_v51 = vadd.f32 %v2023_v17, %v874_v45  ;;  %v977_v52 = vadd.f32 %v2023_v17, %v906_v46  ;;  %v875_v53 = vmul.f32 %v2018_v15, %v699_v49  ;;  %v701_v55 = vpop.f32.mrb[59].mxu0  ;;  %v829_v56 = vpop.f32.mrb[59].mxu1 }
 0x170   :  { %v907_v54 = vmul.f32 %v2018_v15, %v827_v50 }
 0x171   :  { %v1009_v57 = vmax.f32 %v945_v51, 0.0  ;;  %v1041_v58 = vmax.f32 %v977_v52, 0.0  ;;  %v946_v59 = vadd.f32 %v2023_v17, %v875_v53 }
 0x172   :  { %v978_v60 = vadd.f32 %v2023_v17, %v907_v54 }
 0x173   :  { %v1570_v61 = vpack.c.bf16 %v1009_v57, %v1009_v57  ;;  %v1602_v62 = vpack.c.bf16 %v1041_v58, %v1041_v58  ;;  %v1010_v63 = vmax.f32 %v946_v59, 0.0 }
 0x174   :  { %v1042_v0 = vmax.f32 %v978_v60, 0.0  ;;  %v704_v1 = vpop.f32.mrb[60].mxu0  ;;  %v832_v2 = vpop.f32.mrb[60].mxu1 }
 0x175   :  { %1330 = vst.msk [vmem:[%s2413_s4 + $0x70] sm:$0xf] %vm1301_vm3, %v1570_v61  ;;  %1362 = vst.msk [vmem:[%s2413_s4 + $0xf0] sm:$0xf] %vm1301_vm3, %v1602_v62  ;;  %v1571_v3 = vpack.c.bf16 %v1010_v63, %v1010_v63  ;;  %v876_v5 = vmul.f32 %v2018_v15, %v704_v1  ;;  %v908_v6 = vmul.f32 %v2018_v15, %v832_v2  ;;  %v706_v7 = vpop.f32.mrb[61].mxu0  ;;  %v834_v8 = vpop.f32.mrb[61].mxu1 }
 0x176   :  { %v1603_v4 = vpack.c.bf16 %v1042_v0, %v1042_v0  ;;  %v707_v9 = vpop.f32.mrb[62].mxu0  ;;  %v835_v10 = vpop.f32.mrb[62].mxu1 }
 0x177   :  { %1331 = vst.msk [vmem:[%s2413_s4 + $0x74] sm:$0xf] %vm1301_vm3, %v1571_v3  ;;  %v947_v11 = vadd.f32 %v2023_v17, %v876_v5  ;;  %v979_v12 = vadd.f32 %v2023_v17, %v908_v6  ;;  %v877_v13 = vmul.f32 %v2018_v15, %v707_v9  ;;  %v909_v14 = vmul.f32 %v2018_v15, %v835_v10  ;;  %v709_v16 = vpop.f32.mrb[63].mxu0  ;;  %v837_v18 = vpop.f32.mrb[63].mxu1 }
 0x178   :  { %1363 = vst.msk [vmem:[%s2413_s4 + $0xf4] sm:$0xf] %vm1301_vm3, %v1603_v4 }
 0x179   :  { %v1011_v19 = vmax.f32 %v947_v11, 0.0  ;;  %v1043_v20 = vmax.f32 %v979_v12, 0.0  ;;  %v948_v21 = vadd.f32 %v2023_v17, %v877_v13  ;;  %v980_v22 = vadd.f32 %v2023_v17, %v909_v14 }
 0x17b   :  { %v1572_v23 = vpack.c.bf16 %v1011_v19, %v1011_v19  ;;  %v1604_v24 = vpack.c.bf16 %v1043_v20, %v1043_v20  ;;  %v1012_v25 = vmax.f32 %v948_v21, 0.0  ;;  %v1044_v26 = vmax.f32 %v980_v22, 0.0 }
 0x17d   :  { %1332 = vst.msk [vmem:[%s2413_s4 + $0x78] sm:$0xf] %vm1301_vm3, %v1572_v23  ;;  %1364 = vst.msk [vmem:[%s2413_s4 + $0xf8] sm:$0xf] %vm1301_vm3, %v1604_v24  ;;  %v1573_v15 = vpack.c.bf16 %v1012_v25, %v1012_v25  ;;  %v1605_v27 = vpack.c.bf16 %v1044_v26, %v1044_v26 }
 0x17f   :  { %1333 = vst.msk [vmem:[%s2413_s4 + $0x7c] sm:$0xf] %vm1301_vm3, %v1573_v15  ;;  %1365 = vst.msk [vmem:[%s2413_s4 + $0xfc] sm:$0xf] %vm1301_vm3, %v1605_v27 }

</bundles_post_ra>
